<compile_context>
chip_gen: v7x
topology: tpu7x:2x2x1
jax: 0.10.0
libtpu: 0.0.40
codegen_flags: <defaults>
</compile_context>

<pallas_src>
import functools

import jax
import jax.numpy as jnp
from jax.experimental import pallas as pl
from jax.experimental.pallas import tpu as pltpu


PATCH = 4


def _round_up(x, m):
    return (x + m - 1) // m * m


# ------------------------------ fused kernel ------------------------------- #

def _fused_kernel(x_ref, cond_ref, we_ref, be_ref,
                  lng_ref, lnb_ref, w1_ref, b1_ref, w2_ref, b2_ref,
                  wh_ref, bh_ref, o_ref, *, num_blocks, embed_dim, apply_sigmoid):
    # ---- patch embed (bf16 MXU, f32 accumulate) + condition FiLM (f32 VPU) ----
    x = x_ref[0]                                                    # (TM, Pin) bf16
    h = jnp.dot(x, we_ref[...], preferred_element_type=jnp.float32)
    h = h + be_ref[...]                                             # (1, D) f32

    cond = cond_ref[0]                                              # (1, 2D) f32
    gamma = cond[:, :embed_dim]
    beta = cond[:, embed_dim:]
    h = h * (1.0 + gamma) + beta                                    # FiLM

    # ---- mixer blocks (pre-LN residual MLP; SS2D stand-in), h stays in VMEM ---
    for l in range(num_blocks):
        mu = jnp.mean(h, axis=-1, keepdims=True)
        ms = jnp.mean(h * h, axis=-1, keepdims=True)
        var = ms - mu * mu                                          # one-pass variance
        xn = (h - mu) * jax.lax.rsqrt(var + 1e-5)
        xn = xn * lng_ref[l] + lnb_ref[l]
        z = jnp.dot(xn.astype(jnp.bfloat16), w1_ref[l],
                    preferred_element_type=jnp.float32) + b1_ref[l]
        z = jax.nn.gelu(z)        # tanh approx; TODO(synk): exact-erf GELU for bit-parity
        z = jnp.dot(z.astype(jnp.bfloat16), w2_ref[l],
                    preferred_element_type=jnp.float32) + b2_ref[l]
        h = h + z

    # ---- decode head (+ sigmoid iff num_classes == 1, as in the reference) ----
    y = jnp.dot(h.astype(jnp.bfloat16), wh_ref[...],
                preferred_element_type=jnp.float32) + bh_ref[...]
    if apply_sigmoid:
        y = jax.nn.sigmoid(y)
    o_ref[0] = y.astype(o_ref.dtype)


# ------------------------------ model wrapper ------------------------------ #

def init_params(key, in_chans=3, cond_dim=4, embed_dim=32, hidden_dim=64,
                num_blocks=2, num_classes=1):
    ks = jax.random.split(key, 3 + 2 * num_blocks)
    p_in = PATCH * PATCH * in_chans
    p_out = PATCH * PATCH * num_classes

    def lin(k, fan_in, shape):
        return (jax.random.normal(k, shape, jnp.float32) / jnp.sqrt(fan_in)).astype(jnp.float32)

    params = {
        "w_embed": lin(ks[0], p_in, (p_in, embed_dim)),
        "b_embed": jnp.zeros((1, embed_dim), jnp.float32),
        "w_cond": lin(ks[1], cond_dim, (cond_dim, 2 * embed_dim)),
        "b_cond": jnp.zeros((1, 2 * embed_dim), jnp.float32),
        "w_head": lin(ks[2], embed_dim, (embed_dim, p_out)),
        "b_head": jnp.zeros((1, p_out), jnp.float32),
        # stacked per-block (SS2D stand-in) parameters: leading axis = block index
        "ln_g": jnp.ones((num_blocks, 1, embed_dim), jnp.float32),
        "ln_b": jnp.zeros((num_blocks, 1, embed_dim), jnp.float32),
        "w1": jnp.stack([lin(ks[3 + 2 * i], embed_dim, (embed_dim, hidden_dim))
                         for i in range(num_blocks)]),
        "b1": jnp.zeros((num_blocks, 1, hidden_dim), jnp.float32),
        "w2": jnp.stack([lin(ks[4 + 2 * i], hidden_dim, (hidden_dim, embed_dim))
                         for i in range(num_blocks)]),
        "b2": jnp.zeros((num_blocks, 1, embed_dim), jnp.float32),
    }
    return params


@functools.partial(jax.jit, static_argnames=("num_classes",))
def sum_graph_forward(params, x, condition, num_classes=1):
    """Forward pass mirroring SUM_graph.forward.

    x:         (B, C, H, W)  NCHW image (C == 1 or 3)
    condition: (B, cond_dim) condition vector
    returns:   (B, num_classes, H, W); sigmoid applied iff num_classes == 1
    """
    B, C, H, W = x.shape
    if C == 1:                       # x = x.repeat(1, 3, 1, 1)
        x = jnp.tile(x, (1, 3, 1, 1))
        C = 3

    Hp, Wp = H // PATCH, W // PATCH
    T = Hp * Wp
    p_in = PATCH * PATCH * C
    D = params["w_embed"].shape[1]
    Hd = params["w1"].shape[-1]
    L = params["w1"].shape[0]
    p_out = params["w_head"].shape[1]

    # --- glue: NCHW -> (B, T, p_in) patch tokens (streamed as bf16) ----------
    x_nhwc = jnp.transpose(x, (0, 2, 3, 1))
    patches = x_nhwc.reshape(B, Hp, PATCH, Wp, PATCH, C)
    patches = jnp.transpose(patches, (0, 1, 3, 2, 4, 5))
    tokens = patches.reshape(B, T, p_in).astype(jnp.bfloat16)

    # --- glue: condition -> (B, 1, 2D) FiLM params (NO per-token repeat) -----
    cond_emb = condition.astype(jnp.float32) @ params["w_cond"] + params["b_cond"]
    cond_emb = cond_emb.reshape(B, 1, 2 * D)

    # --- token tiling: rows multiple of 8, pad T so the grid divides evenly --
    TM = 1024 if T >= 1024 else _round_up(T, 8)
    T_pad = _round_up(T, TM)
    if T_pad != T:
        tokens = jnp.pad(tokens, ((0, 0), (0, T_pad - T), (0, 0)))
    n_tiles = T_pad // TM

    # --- bf16 matmul weights (biases / LN params stay f32) -------------------
    w_embed = params["w_embed"].astype(jnp.bfloat16)
    w1 = params["w1"].astype(jnp.bfloat16)
    w2 = params["w2"].astype(jnp.bfloat16)
    w_head = params["w_head"].astype(jnp.bfloat16)

    kernel = functools.partial(
        _fused_kernel, num_blocks=L, embed_dim=D,
        apply_sigmoid=(num_classes == 1))

    const3 = lambda b, i: (0, 0, 0)   # weights stay VMEM-resident across the grid
    const2 = lambda b, i: (0, 0)

    grid_spec = pltpu.PrefetchScalarGridSpec(
        num_scalar_prefetch=0,
        grid=(B, n_tiles),
        in_specs=[
            pl.BlockSpec((1, TM, p_in), lambda b, i: (b, i, 0)),     # tokens
            pl.BlockSpec((1, 1, 2 * D), lambda b, i: (b, 0, 0)),     # cond_emb (per batch)
            pl.BlockSpec((p_in, D), const2),                         # w_embed
            pl.BlockSpec((1, D), const2),                            # b_embed
            pl.BlockSpec((L, 1, D), const3),                         # ln_g
            pl.BlockSpec((L, 1, D), const3),                         # ln_b
            pl.BlockSpec((L, D, Hd), const3),                        # w1
            pl.BlockSpec((L, 1, Hd), const3),                        # b1
            pl.BlockSpec((L, Hd, D), const3),                        # w2
            pl.BlockSpec((L, 1, D), const3),                         # b2
            pl.BlockSpec((D, p_out), const2),                        # w_head
            pl.BlockSpec((1, p_out), const2),                        # b_head
        ],
        out_specs=pl.BlockSpec((1, TM, p_out), lambda b, i: (b, i, 0)),
    )

    y_tok = pl.pallas_call(
        kernel,
        out_shape=jax.ShapeDtypeStruct((B, T_pad, p_out), jnp.float32),
        grid_spec=grid_spec,
        compiler_params=pltpu.CompilerParams(
            dimension_semantics=("parallel", "parallel"),
            vmem_limit_bytes=32 * 1024 * 1024),
    )(tokens, cond_emb, w_embed, params["b_embed"],
      params["ln_g"], params["ln_b"], w1, params["b1"], w2, params["b2"],
      w_head, params["b_head"])

    # --- glue: tokens -> (B, num_classes, H, W) -------------------------------
    y_tok = y_tok[:, :T, :]
    y = y_tok.reshape(B, Hp, Wp, PATCH, PATCH, num_classes)
    y = jnp.transpose(y, (0, 5, 1, 3, 2, 4)).reshape(B, num_classes, H, W)
    return y


if __name__ == "__main__":
    key = jax.random.PRNGKey(0)
    k_param, k_x, k_c = jax.random.split(key, 3)

    B, H, W = 2, 16, 16
    cond_dim = 4

    params = init_params(k_param, in_chans=3, cond_dim=cond_dim,
                         embed_dim=32, hidden_dim=64, num_blocks=2, num_classes=1)

    # single-channel input exercises the `x.repeat(1, 3, 1, 1)` branch
    x = jax.random.normal(k_x, (B, 1, H, W), jnp.float32)
    condition = jax.nn.one_hot(jax.random.randint(k_c, (B,), 0, cond_dim), cond_dim)

    out = sum_graph_forward(params, x, condition, num_classes=1)
    out = jax.block_until_ready(out)

    assert out.shape == (B, 1, H, W), out.shape
    assert bool(jnp.all(jnp.isfinite(out)))
    assert bool(jnp.all((out >= 0.0) & (out <= 1.0)))  # sigmoid output range
    print("KERNEL_OK")
</pallas_src>

<mosaic_0001>
module attributes {stable_mosaic.version = 11 : i64} {
  func.func @_fused_kernel(%arg0: i32, %arg1: i32, %arg2: memref<1x16x48xbf16, #tpu.memory_space<vmem>>, %arg3: memref<1x1x64xf32, #tpu.memory_space<vmem>>, %arg4: memref<48x32xbf16, #tpu.memory_space<vmem>>, %arg5: memref<1x32xf32, #tpu.memory_space<vmem>>, %arg6: memref<2x1x32xf32, #tpu.memory_space<vmem>>, %arg7: memref<2x1x32xf32, #tpu.memory_space<vmem>>, %arg8: memref<2x32x64xbf16, #tpu.memory_space<vmem>>, %arg9: memref<2x1x64xf32, #tpu.memory_space<vmem>>, %arg10: memref<2x64x32xbf16, #tpu.memory_space<vmem>>, %arg11: memref<2x1x32xf32, #tpu.memory_space<vmem>>, %arg12: memref<32x16xbf16, #tpu.memory_space<vmem>>, %arg13: memref<1x16xf32, #tpu.memory_space<vmem>>, %arg14: memref<1x16x16xf32, #tpu.memory_space<vmem>>) attributes {dimension_semantics = [#tpu.dimension_semantics<parallel>, #tpu.dimension_semantics<parallel>], iteration_bounds = array<i64: 2, 1>, scalar_prefetch = 0 : i64, scratch_operands = 0 : i64, tpu.core_type = #tpu.core_type<tc>, window_params = [{transform_indices = @transform_0, window_bounds = array<i64: 1, 16, 48>}, {transform_indices = @transform_1, window_bounds = array<i64: 1, 1, 64>}, {pipeline_mode = #tpu.pipeline_mode<synchronous>, transform_indices = @transform_2, window_bounds = array<i64: 48, 32>}, {pipeline_mode = #tpu.pipeline_mode<synchronous>, transform_indices = @transform_3, window_bounds = array<i64: 1, 32>}, {pipeline_mode = #tpu.pipeline_mode<synchronous>, transform_indices = @transform_4, window_bounds = array<i64: 2, 1, 32>}, {pipeline_mode = #tpu.pipeline_mode<synchronous>, transform_indices = @transform_5, window_bounds = array<i64: 2, 1, 32>}, {pipeline_mode = #tpu.pipeline_mode<synchronous>, transform_indices = @transform_6, window_bounds = array<i64: 2, 32, 64>}, {pipeline_mode = #tpu.pipeline_mode<synchronous>, transform_indices = @transform_7, window_bounds = array<i64: 2, 1, 64>}, {pipeline_mode = #tpu.pipeline_mode<synchronous>, transform_indices = @transform_8, window_bounds = array<i64: 2, 64, 32>}, {pipeline_mode = #tpu.pipeline_mode<synchronous>, transform_indices = @transform_9, window_bounds = array<i64: 2, 1, 32>}, {pipeline_mode = #tpu.pipeline_mode<synchronous>, transform_indices = @transform_10, window_bounds = array<i64: 32, 16>}, {pipeline_mode = #tpu.pipeline_mode<synchronous>, transform_indices = @transform_11, window_bounds = array<i64: 1, 16>}, {transform_indices = @transform_12, window_bounds = array<i64: 1, 16, 16>}]} {
    %c0 = arith.constant 0 : index
    %c0_0 = arith.constant 0 : index
    %c0_1 = arith.constant 0 : index
    %0 = vector.load %arg2[%c0, %c0_0, %c0_1] : memref<1x16x48xbf16, #tpu.memory_space<vmem>>, vector<1x16x48xbf16>
    %1 = vector.shape_cast %0 : vector<1x16x48xbf16> to vector<16x48xbf16>
    %c0_2 = arith.constant 0 : index
    %c0_3 = arith.constant 0 : index
    %2 = vector.load %arg4[%c0_2, %c0_3] : memref<48x32xbf16, #tpu.memory_space<vmem>>, vector<48x32xbf16>
    %cst = arith.constant dense<0.000000e+00> : vector<16x32xf32>
    %3 = tpu.matmul %1, %2, %cst {dimension_numbers = #tpu.dot_dimension_numbers<[1], [0], [0], [1], [0, 0, 1, 1], [], []>} : vector<16x48xbf16>, vector<48x32xbf16>, vector<16x32xf32> -> vector<16x32xf32>
    %c0_4 = arith.constant 0 : index
    %c0_5 = arith.constant 0 : index
    %4 = vector.load %arg5[%c0_4, %c0_5] : memref<1x32xf32, #tpu.memory_space<vmem>>, vector<1x32xf32>
    %5 = vector.broadcast %4 : vector<1x32xf32> to vector<16x32xf32>
    %6 = arith.addf %3, %5 : vector<16x32xf32>
    %c0_6 = arith.constant 0 : index
    %c0_7 = arith.constant 0 : index
    %c0_8 = arith.constant 0 : index
    %7 = vector.load %arg3[%c0_6, %c0_7, %c0_8] : memref<1x1x64xf32, #tpu.memory_space<vmem>>, vector<1x1x64xf32>
    %8 = vector.shape_cast %7 : vector<1x1x64xf32> to vector<1x64xf32>
    %9 = vector.extract_strided_slice %8 {offsets = [0, 0], sizes = [1, 32], strides = [1, 1]} : vector<1x64xf32> to vector<1x32xf32>
    %10 = vector.extract_strided_slice %8 {offsets = [0, 32], sizes = [1, 32], strides = [1, 1]} : vector<1x64xf32> to vector<1x32xf32>
    %cst_9 = arith.constant 1.000000e+00 : f32
    %11 = vector.broadcast %cst_9 : f32 to vector<1x32xf32>
    %12 = arith.addf %11, %9 : vector<1x32xf32>
    %13 = vector.broadcast %12 : vector<1x32xf32> to vector<16x32xf32>
    %14 = arith.mulf %6, %13 : vector<16x32xf32>
    %15 = vector.broadcast %10 : vector<1x32xf32> to vector<16x32xf32>
    %16 = arith.addf %14, %15 : vector<16x32xf32>
    %cst_10 = arith.constant dense<0.000000e+00> : vector<16xf32>
    %17 = vector.multi_reduction <add>, %16, %cst_10 [1] : vector<16x32xf32> to vector<16xf32>
    %18 = vector.shape_cast %17 : vector<16xf32> to vector<16x1xf32>
    %cst_11 = arith.constant 3.200000e+01 : f32
    %19 = vector.broadcast %cst_11 : f32 to vector<16x1xf32>
    %20 = arith.divf %18, %19 : vector<16x1xf32>
    %21 = arith.mulf %16, %16 : vector<16x32xf32>
    %cst_12 = arith.constant dense<0.000000e+00> : vector<16xf32>
    %22 = vector.multi_reduction <add>, %21, %cst_12 [1] : vector<16x32xf32> to vector<16xf32>
    %23 = vector.shape_cast %22 : vector<16xf32> to vector<16x1xf32>
    %cst_13 = arith.constant 3.200000e+01 : f32
    %24 = vector.broadcast %cst_13 : f32 to vector<16x1xf32>
    %25 = arith.divf %23, %24 : vector<16x1xf32>
    %26 = arith.mulf %20, %20 : vector<16x1xf32>
    %27 = arith.subf %25, %26 : vector<16x1xf32>
    %28 = vector.broadcast %20 : vector<16x1xf32> to vector<16x32xf32>
    %29 = arith.subf %16, %28 : vector<16x32xf32>
    %cst_14 = arith.constant 9.99999974E-6 : f32
    %30 = vector.broadcast %cst_14 : f32 to vector<16x1xf32>
    %31 = arith.addf %27, %30 : vector<16x1xf32>
    %32 = math.rsqrt %31 : vector<16x1xf32>
    %33 = vector.broadcast %32 : vector<16x1xf32> to vector<16x32xf32>
    %34 = arith.mulf %29, %33 : vector<16x32xf32>
    %c0_15 = arith.constant 0 : index
    %c0_16 = arith.constant 0 : index
    %c0_17 = arith.constant 0 : index
    %35 = vector.load %arg6[%c0_15, %c0_16, %c0_17] : memref<2x1x32xf32, #tpu.memory_space<vmem>>, vector<1x1x32xf32>
    %36 = vector.shape_cast %35 : vector<1x1x32xf32> to vector<1x32xf32>
    %37 = vector.broadcast %36 : vector<1x32xf32> to vector<16x32xf32>
    %38 = arith.mulf %34, %37 : vector<16x32xf32>
    %c0_18 = arith.constant 0 : index
    %c0_19 = arith.constant 0 : index
    %c0_20 = arith.constant 0 : index
    %39 = vector.load %arg7[%c0_18, %c0_19, %c0_20] : memref<2x1x32xf32, #tpu.memory_space<vmem>>, vector<1x1x32xf32>
    %40 = vector.shape_cast %39 : vector<1x1x32xf32> to vector<1x32xf32>
    %41 = vector.broadcast %40 : vector<1x32xf32> to vector<16x32xf32>
    %42 = arith.addf %38, %41 : vector<16x32xf32>
    %43 = arith.truncf %42 : vector<16x32xf32> to vector<16x32xbf16>
    %c0_21 = arith.constant 0 : index
    %c0_22 = arith.constant 0 : index
    %c0_23 = arith.constant 0 : index
    %44 = vector.load %arg8[%c0_21, %c0_22, %c0_23] : memref<2x32x64xbf16, #tpu.memory_space<vmem>>, vector<1x32x64xbf16>
    %45 = vector.shape_cast %44 : vector<1x32x64xbf16> to vector<32x64xbf16>
    %cst_24 = arith.constant dense<0.000000e+00> : vector<16x64xf32>
    %46 = tpu.matmul %43, %45, %cst_24 {dimension_numbers = #tpu.dot_dimension_numbers<[1], [0], [0], [1], [0, 0, 1, 1], [], []>} : vector<16x32xbf16>, vector<32x64xbf16>, vector<16x64xf32> -> vector<16x64xf32>
    %c0_25 = arith.constant 0 : index
    %c0_26 = arith.constant 0 : index
    %c0_27 = arith.constant 0 : index
    %47 = vector.load %arg9[%c0_25, %c0_26, %c0_27] : memref<2x1x64xf32, #tpu.memory_space<vmem>>, vector<1x1x64xf32>
    %48 = vector.shape_cast %47 : vector<1x1x64xf32> to vector<1x64xf32>
    %49 = vector.broadcast %48 : vector<1x64xf32> to vector<16x64xf32>
    %50 = arith.addf %46, %49 : vector<16x64xf32>
    %51 = arith.mulf %50, %50 : vector<16x64xf32>
    %52 = arith.mulf %50, %51 : vector<16x64xf32>
    %cst_28 = arith.constant 4.471500e-02 : f32
    %53 = vector.broadcast %cst_28 : f32 to vector<16x64xf32>
    %54 = arith.mulf %53, %52 : vector<16x64xf32>
    %55 = arith.addf %50, %54 : vector<16x64xf32>
    %cst_29 = arith.constant 0.797884583 : f32
    %56 = vector.broadcast %cst_29 : f32 to vector<16x64xf32>
    %57 = arith.mulf %56, %55 : vector<16x64xf32>
    %58 = math.tanh %57 : vector<16x64xf32>
    %cst_30 = arith.constant 1.000000e+00 : f32
    %59 = vector.broadcast %cst_30 : f32 to vector<16x64xf32>
    %60 = arith.addf %59, %58 : vector<16x64xf32>
    %cst_31 = arith.constant 5.000000e-01 : f32
    %61 = vector.broadcast %cst_31 : f32 to vector<16x64xf32>
    %62 = arith.mulf %61, %60 : vector<16x64xf32>
    %63 = arith.mulf %50, %62 : vector<16x64xf32>
    %64 = arith.truncf %63 : vector<16x64xf32> to vector<16x64xbf16>
    %c0_32 = arith.constant 0 : index
    %c0_33 = arith.constant 0 : index
    %c0_34 = arith.constant 0 : index
    %65 = vector.load %arg10[%c0_32, %c0_33, %c0_34] : memref<2x64x32xbf16, #tpu.memory_space<vmem>>, vector<1x64x32xbf16>
    %66 = vector.shape_cast %65 : vector<1x64x32xbf16> to vector<64x32xbf16>
    %cst_35 = arith.constant dense<0.000000e+00> : vector<16x32xf32>
    %67 = tpu.matmul %64, %66, %cst_35 {dimension_numbers = #tpu.dot_dimension_numbers<[1], [0], [0], [1], [0, 0, 1, 1], [], []>} : vector<16x64xbf16>, vector<64x32xbf16>, vector<16x32xf32> -> vector<16x32xf32>
    %c0_36 = arith.constant 0 : index
    %c0_37 = arith.constant 0 : index
    %c0_38 = arith.constant 0 : index
    %68 = vector.load %arg11[%c0_36, %c0_37, %c0_38] : memref<2x1x32xf32, #tpu.memory_space<vmem>>, vector<1x1x32xf32>
    %69 = vector.shape_cast %68 : vector<1x1x32xf32> to vector<1x32xf32>
    %70 = vector.broadcast %69 : vector<1x32xf32> to vector<16x32xf32>
    %71 = arith.addf %67, %70 : vector<16x32xf32>
    %72 = arith.addf %16, %71 : vector<16x32xf32>
    %cst_39 = arith.constant dense<0.000000e+00> : vector<16xf32>
    %73 = vector.multi_reduction <add>, %72, %cst_39 [1] : vector<16x32xf32> to vector<16xf32>
    %74 = vector.shape_cast %73 : vector<16xf32> to vector<16x1xf32>
    %cst_40 = arith.constant 3.200000e+01 : f32
    %75 = vector.broadcast %cst_40 : f32 to vector<16x1xf32>
    %76 = arith.divf %74, %75 : vector<16x1xf32>
    %77 = arith.mulf %72, %72 : vector<16x32xf32>
    %cst_41 = arith.constant dense<0.000000e+00> : vector<16xf32>
    %78 = vector.multi_reduction <add>, %77, %cst_41 [1] : vector<16x32xf32> to vector<16xf32>
    %79 = vector.shape_cast %78 : vector<16xf32> to vector<16x1xf32>
    %cst_42 = arith.constant 3.200000e+01 : f32
    %80 = vector.broadcast %cst_42 : f32 to vector<16x1xf32>
    %81 = arith.divf %79, %80 : vector<16x1xf32>
    %82 = arith.mulf %76, %76 : vector<16x1xf32>
    %83 = arith.subf %81, %82 : vector<16x1xf32>
    %84 = vector.broadcast %76 : vector<16x1xf32> to vector<16x32xf32>
    %85 = arith.subf %72, %84 : vector<16x32xf32>
    %cst_43 = arith.constant 9.99999974E-6 : f32
    %86 = vector.broadcast %cst_43 : f32 to vector<16x1xf32>
    %87 = arith.addf %83, %86 : vector<16x1xf32>
    %88 = math.rsqrt %87 : vector<16x1xf32>
    %89 = vector.broadcast %88 : vector<16x1xf32> to vector<16x32xf32>
    %90 = arith.mulf %85, %89 : vector<16x32xf32>
    %c1 = arith.constant 1 : index
    %c0_44 = arith.constant 0 : index
    %c0_45 = arith.constant 0 : index
    %91 = vector.load %arg6[%c1, %c0_44, %c0_45] : memref<2x1x32xf32, #tpu.memory_space<vmem>>, vector<1x1x32xf32>
    %92 = vector.shape_cast %91 : vector<1x1x32xf32> to vector<1x32xf32>
    %93 = vector.broadcast %92 : vector<1x32xf32> to vector<16x32xf32>
    %94 = arith.mulf %90, %93 : vector<16x32xf32>
    %c1_46 = arith.constant 1 : index
    %c0_47 = arith.constant 0 : index
    %c0_48 = arith.constant 0 : index
    %95 = vector.load %arg7[%c1_46, %c0_47, %c0_48] : memref<2x1x32xf32, #tpu.memory_space<vmem>>, vector<1x1x32xf32>
    %96 = vector.shape_cast %95 : vector<1x1x32xf32> to vector<1x32xf32>
    %97 = vector.broadcast %96 : vector<1x32xf32> to vector<16x32xf32>
    %98 = arith.addf %94, %97 : vector<16x32xf32>
    %99 = arith.truncf %98 : vector<16x32xf32> to vector<16x32xbf16>
    %c1_49 = arith.constant 1 : index
    %c0_50 = arith.constant 0 : index
    %c0_51 = arith.constant 0 : index
    %100 = vector.load %arg8[%c1_49, %c0_50, %c0_51] : memref<2x32x64xbf16, #tpu.memory_space<vmem>>, vector<1x32x64xbf16>
    %101 = vector.shape_cast %100 : vector<1x32x64xbf16> to vector<32x64xbf16>
    %cst_52 = arith.constant dense<0.000000e+00> : vector<16x64xf32>
    %102 = tpu.matmul %99, %101, %cst_52 {dimension_numbers = #tpu.dot_dimension_numbers<[1], [0], [0], [1], [0, 0, 1, 1], [], []>} : vector<16x32xbf16>, vector<32x64xbf16>, vector<16x64xf32> -> vector<16x64xf32>
    %c1_53 = arith.constant 1 : index
    %c0_54 = arith.constant 0 : index
    %c0_55 = arith.constant 0 : index
    %103 = vector.load %arg9[%c1_53, %c0_54, %c0_55] : memref<2x1x64xf32, #tpu.memory_space<vmem>>, vector<1x1x64xf32>
    %104 = vector.shape_cast %103 : vector<1x1x64xf32> to vector<1x64xf32>
    %105 = vector.broadcast %104 : vector<1x64xf32> to vector<16x64xf32>
    %106 = arith.addf %102, %105 : vector<16x64xf32>
    %107 = arith.mulf %106, %106 : vector<16x64xf32>
    %108 = arith.mulf %106, %107 : vector<16x64xf32>
    %cst_56 = arith.constant 4.471500e-02 : f32
    %109 = vector.broadcast %cst_56 : f32 to vector<16x64xf32>
    %110 = arith.mulf %109, %108 : vector<16x64xf32>
    %111 = arith.addf %106, %110 : vector<16x64xf32>
    %cst_57 = arith.constant 0.797884583 : f32
    %112 = vector.broadcast %cst_57 : f32 to vector<16x64xf32>
    %113 = arith.mulf %112, %111 : vector<16x64xf32>
    %114 = math.tanh %113 : vector<16x64xf32>
    %cst_58 = arith.constant 1.000000e+00 : f32
    %115 = vector.broadcast %cst_58 : f32 to vector<16x64xf32>
    %116 = arith.addf %115, %114 : vector<16x64xf32>
    %cst_59 = arith.constant 5.000000e-01 : f32
    %117 = vector.broadcast %cst_59 : f32 to vector<16x64xf32>
    %118 = arith.mulf %117, %116 : vector<16x64xf32>
    %119 = arith.mulf %106, %118 : vector<16x64xf32>
    %120 = arith.truncf %119 : vector<16x64xf32> to vector<16x64xbf16>
    %c1_60 = arith.constant 1 : index
    %c0_61 = arith.constant 0 : index
    %c0_62 = arith.constant 0 : index
    %121 = vector.load %arg10[%c1_60, %c0_61, %c0_62] : memref<2x64x32xbf16, #tpu.memory_space<vmem>>, vector<1x64x32xbf16>
    %122 = vector.shape_cast %121 : vector<1x64x32xbf16> to vector<64x32xbf16>
    %cst_63 = arith.constant dense<0.000000e+00> : vector<16x32xf32>
    %123 = tpu.matmul %120, %122, %cst_63 {dimension_numbers = #tpu.dot_dimension_numbers<[1], [0], [0], [1], [0, 0, 1, 1], [], []>} : vector<16x64xbf16>, vector<64x32xbf16>, vector<16x32xf32> -> vector<16x32xf32>
    %c1_64 = arith.constant 1 : index
    %c0_65 = arith.constant 0 : index
    %c0_66 = arith.constant 0 : index
    %124 = vector.load %arg11[%c1_64, %c0_65, %c0_66] : memref<2x1x32xf32, #tpu.memory_space<vmem>>, vector<1x1x32xf32>
    %125 = vector.shape_cast %124 : vector<1x1x32xf32> to vector<1x32xf32>
    %126 = vector.broadcast %125 : vector<1x32xf32> to vector<16x32xf32>
    %127 = arith.addf %123, %126 : vector<16x32xf32>
    %128 = arith.addf %72, %127 : vector<16x32xf32>
    %129 = arith.truncf %128 : vector<16x32xf32> to vector<16x32xbf16>
    %c0_67 = arith.constant 0 : index
    %c0_68 = arith.constant 0 : index
    %130 = vector.load %arg12[%c0_67, %c0_68] : memref<32x16xbf16, #tpu.memory_space<vmem>>, vector<32x16xbf16>
    %cst_69 = arith.constant dense<0.000000e+00> : vector<16x16xf32>
    %131 = tpu.matmul %129, %130, %cst_69 {dimension_numbers = #tpu.dot_dimension_numbers<[1], [0], [0], [1], [0, 0, 1, 1], [], []>} : vector<16x32xbf16>, vector<32x16xbf16>, vector<16x16xf32> -> vector<16x16xf32>
    %c0_70 = arith.constant 0 : index
    %c0_71 = arith.constant 0 : index
    %132 = vector.load %arg13[%c0_70, %c0_71] : memref<1x16xf32, #tpu.memory_space<vmem>>, vector<1x16xf32>
    %133 = vector.broadcast %132 : vector<1x16xf32> to vector<16x16xf32>
    %134 = arith.addf %131, %133 : vector<16x16xf32>
    %135 = arith.negf %134 : vector<16x16xf32>
    %136 = math.exp %135 : vector<16x16xf32>
    %cst_72 = arith.constant 1.000000e+00 : f32
    %137 = vector.broadcast %cst_72 : f32 to vector<16x16xf32>
    %138 = arith.addf %137, %136 : vector<16x16xf32>
    %139 = arith.divf %137, %138 : vector<16x16xf32>
    %c0_73 = arith.constant 0 : index
    %c0_74 = arith.constant 0 : index
    %c0_75 = arith.constant 0 : index
    %140 = vector.load %arg14[%c0_73, %c0_74, %c0_75] : memref<1x16x16xf32, #tpu.memory_space<vmem>>, vector<1x16x16xf32>
    %141 = vector.shape_cast %140 : vector<1x16x16xf32> to vector<16x16xf32>
    %142 = vector.shape_cast %139 : vector<16x16xf32> to vector<1x16x16xf32>
    tpu.vector_store %arg14[%c0_73, %c0_74, %c0_75], %142 {strides = array<i32>} : memref<1x16x16xf32, #tpu.memory_space<vmem>>, vector<1x16x16xf32>,
    return
  }
  func.func @transform_0(%arg0: i32, %arg1: i32) -> (i32, i32, i32) {
    %c0_i32 = arith.constant 0 : i32
    %c0_i32_0 = arith.constant 0 : i32
    return %arg0, %arg1, %c0_i32 : i32, i32, i32
  }
  func.func @transform_1(%arg0: i32, %arg1: i32) -> (i32, i32, i32) {
    %c0_i32 = arith.constant 0 : i32
    %c0_i32_0 = arith.constant 0 : i32
    %c0_i32_1 = arith.constant 0 : i32
    return %arg0, %c0_i32, %c0_i32_0 : i32, i32, i32
  }
  func.func @transform_2(%arg0: i32, %arg1: i32) -> (i32, i32) {
    %c0_i32 = arith.constant 0 : i32
    %c0_i32_0 = arith.constant 0 : i32
    %c0_i32_1 = arith.constant 0 : i32
    return %c0_i32, %c0_i32_0 : i32, i32
  }
  func.func @transform_3(%arg0: i32, %arg1: i32) -> (i32, i32) {
    %c0_i32 = arith.constant 0 : i32
    %c0_i32_0 = arith.constant 0 : i32
    %c0_i32_1 = arith.constant 0 : i32
    return %c0_i32, %c0_i32_0 : i32, i32
  }
  func.func @transform_4(%arg0: i32, %arg1: i32) -> (i32, i32, i32) {
    %c0_i32 = arith.constant 0 : i32
    %c0_i32_0 = arith.constant 0 : i32
    %c0_i32_1 = arith.constant 0 : i32
    %c0_i32_2 = arith.constant 0 : i32
    return %c0_i32, %c0_i32_0, %c0_i32_1 : i32, i32, i32
  }
  func.func @transform_5(%arg0: i32, %arg1: i32) -> (i32, i32, i32) {
    %c0_i32 = arith.constant 0 : i32
    %c0_i32_0 = arith.constant 0 : i32
    %c0_i32_1 = arith.constant 0 : i32
    %c0_i32_2 = arith.constant 0 : i32
    return %c0_i32, %c0_i32_0, %c0_i32_1 : i32, i32, i32
  }
  func.func @transform_6(%arg0: i32, %arg1: i32) -> (i32, i32, i32) {
    %c0_i32 = arith.constant 0 : i32
    %c0_i32_0 = arith.constant 0 : i32
    %c0_i32_1 = arith.constant 0 : i32
    %c0_i32_2 = arith.constant 0 : i32
    return %c0_i32, %c0_i32_0, %c0_i32_1 : i32, i32, i32
  }
  func.func @transform_7(%arg0: i32, %arg1: i32) -> (i32, i32, i32) {
    %c0_i32 = arith.constant 0 : i32
    %c0_i32_0 = arith.constant 0 : i32
    %c0_i32_1 = arith.constant 0 : i32
    %c0_i32_2 = arith.constant 0 : i32
    return %c0_i32, %c0_i32_0, %c0_i32_1 : i32, i32, i32
  }
  func.func @transform_8(%arg0: i32, %arg1: i32) -> (i32, i32, i32) {
    %c0_i32 = arith.constant 0 : i32
    %c0_i32_0 = arith.constant 0 : i32
    %c0_i32_1 = arith.constant 0 : i32
    %c0_i32_2 = arith.constant 0 : i32
    return %c0_i32, %c0_i32_0, %c0_i32_1 : i32, i32, i32
  }
  func.func @transform_9(%arg0: i32, %arg1: i32) -> (i32, i32, i32) {
    %c0_i32 = arith.constant 0 : i32
    %c0_i32_0 = arith.constant 0 : i32
    %c0_i32_1 = arith.constant 0 : i32
    %c0_i32_2 = arith.constant 0 : i32
    return %c0_i32, %c0_i32_0, %c0_i32_1 : i32, i32, i32
  }
  func.func @transform_10(%arg0: i32, %arg1: i32) -> (i32, i32) {
    %c0_i32 = arith.constant 0 : i32
    %c0_i32_0 = arith.constant 0 : i32
    %c0_i32_1 = arith.constant 0 : i32
    return %c0_i32, %c0_i32_0 : i32, i32
  }
  func.func @transform_11(%arg0: i32, %arg1: i32) -> (i32, i32) {
    %c0_i32 = arith.constant 0 : i32
    %c0_i32_0 = arith.constant 0 : i32
    %c0_i32_1 = arith.constant 0 : i32
    return %c0_i32, %c0_i32_0 : i32, i32
  }
  func.func @transform_12(%arg0: i32, %arg1: i32) -> (i32, i32, i32) {
    %c0_i32 = arith.constant 0 : i32
    %c0_i32_0 = arith.constant 0 : i32
    return %arg0, %arg1, %c0_i32 : i32, i32, i32
  }
}

</mosaic_0001>

<bundles_post_ra>
// kernel: sum_graph_forward.1
= control target key start
LH: loop header
LB: loop body
LE: loop exit
PB: predicated region body
PF: predicated region fallthrough
CT: control target
= control target key end

     0   :  { %s1506_s21 = smov 0   ;;  %s1508_s22 = smov 0   ;;  %s1698_s0 = inlined_call_operand.vmem [shape: bf16[2,16,48], index: 0, kind: input, shape index: {}]   ;;  %s1699_s1 = inlined_call_operand.vmem [shape: f32[2,1,64], index: 1, kind: input, shape index: {}]   ;;  %s1700_s2 = inlined_call_operand.vmem [shape: bf16[48,32], index: 2, kind: input, shape index: {}]   ;;  %s1701_s3 = inlined_call_operand.vmem [shape: f32[1,32], index: 3, kind: input, shape index: {}]   ;;  %s1702_s4 = inlined_call_operand.vmem [shape: f32[2,1,32], index: 4, kind: input, shape index: {}]   ;;  %s1703_s5 = inlined_call_operand.vmem [shape: f32[2,1,32], index: 5, kind: input, shape index: {}]   ;;  %s1704_s6 = inlined_call_operand.vmem [shape: bf16[2,32,64], index: 6, kind: input, shape index: {}]   ;;  %s1705_s7 = inlined_call_operand.vmem [shape: f32[2,1,64], index: 7, kind: input, shape index: {}]   ;;  %s1706_s8 = inlined_call_operand.vmem [shape: bf16[2,64,32], index: 8, kind: input, shape index: {}]   ;;  %s1707_s9 = inlined_call_operand.vmem [shape: f32[2,1,32], index: 9, kind: input, shape index: {}]   ;;  %s1708_s10 = inlined_call_operand.vmem [shape: bf16[32,16], index: 10, kind: input, shape index: {}]   ;;  %s1709_s11 = inlined_call_operand.vmem [shape: f32[1,16], index: 11, kind: input, shape index: {}]   ;;  %s1710_s12 = inlined_call_operand.vmem [shape: f32[2,16,16], index: 12, kind: output, shape index: {}]  }
   0x1   :  { %s1510_s23 = smov 0  }
   0x2 LB: > { %s34_s24 = sadd.s32 1, %s1432_s22  ;;  %p1203_p0 = scmp.ge.s32.totalorder %s1436_s23, 1  ;;  %s1436_s23 = sphi %s1510_s23, %s22_s23   ;;  %s1432_s22 = sphi %s1508_s22, %s1712_s22   ;;  %s1428_s21 = sphi %s1506_s21, %s1711_s21  }
   0x3   : > { %p36_p1 = scmp.ge.s32.totalorder %s34_s24, 2  ;;  %p391_p2 = scmp.lt.s32.totalorder %s1436_s23, 3 }
   0x5   : > { %s1714_s24 = smov (%p36_p1, %s34_s24), 0  ;;  %p392_p3 = pnand %p1203_p0, %p391_p2 }
   0x6   : > { %v1372_v0 = vld [vmem:[%s1700_s2] sm:$0xff] (!%p392_p3)   ;;  %v554_v1 = vlaneseq (!%p392_p3)  ;;  %v1438_v2 = vmov (!%p392_p3), 0.0   ;;  %v1373_v3 = vld [vmem:[%s1700_s2 + $0x8] sm:$0xff] (!%p392_p3)   ;;  %vm1439_vm0 = vmmov (!%p392_p3), 0   ;;  %p445_p4 = scmp.lt.s32.totalorder (!%p392_p3), %s1428_s21, 1  ;;  %v1374_v5 = vld [vmem:[%s1700_s2 + $0x10] sm:$0xff] (!%p392_p3)  }
   0x7   : > { %395 = sbr.rel (%p392_p3) target bundleno = 1764 (0x6e4), region = 68  ;;  %1287 = vmatprep.subr.bf16.mxu0 (!%p392_p3), %v1438_v2  ;;  %1297 = vmatprep.subr.bf16.mxu1 (!%p392_p3), %v1438_v2  ;;  %vm506_vm1 = vcmask (!%p392_p3), 392192   ;;  %s1440_s20 = smov (!%p392_p3), 96   ;;  %v1208_v11 = vld [vmem:[%s1701_s3] ss:$0 sm:$0xff] (!%p392_p3)  ;;  %vm571_vm2 = vcmask (!%p392_p3), 261120  }
   0x8   : > { %1288 = vmatpush3.bf16.msra.mxu0 (!%p392_p3), %v1372_v0  ;;  %1293 = vmatprep.mubr.msk.bf16.mxu0 (!%p392_p3), %vm1439_vm0, %v1438_v2  ;;  %v555_v4 = vshrl.u32 (!%p392_p3), %v554_v1, 7  ;;  %v1376_v30 = vld [vmem:[%s1704_s6] sm:$0xff] (!%p392_p3)   ;;  %v1377_v31 = vld [vmem:[%s1704_s6 + $0x8] sm:$0xff] (!%p392_p3)   ;;  %v1380_v61 = vld [vmem:[%s1706_s8 + $0x10] sm:$0xff] (!%p392_p3)   ;;  %vm747_vm3 = vcmask (!%p392_p3), 523264   ;;  %vm1100_vm4 = vcmask (!%p392_p3), 130048  }
   0x9   : > { %1289 = vmatprep.subr.bf16.mxu0 (!%p392_p3), %v1438_v2  ;;  %1301 = vmatprep.mubr.msk.bf16.mxu1 (!%p392_p3), %vm1439_vm0, %v1438_v2  ;;  %v1214_v49 = vld [vmem:[%s1702_s4] ss:$0 sm:$0xff] (!%p392_p3)  ;;  %v1379_v60 = vld [vmem:[%s1706_s8 + $0x8] sm:$0xff] (!%p392_p3)   ;;  %v1381_v62 = vld [vmem:[%s1706_s8 + $0x18] sm:$0xff] (!%p392_p3)  }
   0xa   : > { %v556_v6 = vsub.s32 (!%p392_p3), 0, %v555_v4  ;;  %1298 = vmatpush3.bf16.msra.mxu1 (!%p392_p3), %v1376_v30  ;;  %v1215_v54 = vld [vmem:[%s1703_s5] ss:$0 sm:$0xff] (!%p392_p3) }
   0xb   : > { %1299 = vmatprep.subr.bf16.mxu1 (!%p392_p3), %v1438_v2  ;;  %v1378_v59 = vld [vmem:[%s1706_s8] sm:$0xff] (!%p392_p3)  }
   0xc   : > { %1290 = vmatpush3.bf16.msra.mxu0 (!%p392_p3), %v1373_v3  ;;  %v1216_v63 = vld [vmem:[%s1705_s7] ss:$0 sm:$0xff] (!%p392_p3) }
   0xd   : > { %1291 = vmatprep.subr.bf16.mxu0 (!%p392_p3), %v1438_v2 }
   0xe   : > { %s1716_s21 = smov (!%p445_p4, %s1428_s21), 1  ;;  %1300 = vmatpush3.bf16.msra.mxu1 %v1377_v31 }
   0xf   : > { %s1262_s13 = sshll.u32 %s1716_s21, 3  ;;  %s456_s19 = scalar_lea.vmem %s1699_s1, %s1716_s21  ;;  %1305 = vmatprep.subr.bf16.mxu1 %v1438_v2 }
  0x10   : > { %s452_s16 = scalar_lea.vmem %s1698_s0, %s1262_s13  ;;  %v551_v8 = vld [vmem:[%s456_s19] sm:$0x1]  ;;  %1292 = vmatpush3.bf16.msra.mxu0 %v1374_v5  ;;  %s1263_s13 = sshll.u32 %s1716_s21, 4 }
  0x11   : > { %v1375_v7 = vld [vmem:[%s452_s16] sm:$0xff]   ;;  %v565_v9 = vrot.slane %v551_v8, %v556_v6  ;;  %1317 = vmatprep.subr.bf16.mxu0 %v1438_v2  ;;  %v552_v10 = vadd.f32 1.0, %v551_v8  ;;  %s465_s16 = scalar_lea.vmem %s1710_s12, %s1263_s13 }
  0x13   : > { %566 = vrot.lane.b32.xlu0 %v565_v9, %s1440_s20  ;;  %1294 = vmatmul.mubr.msk.bf16.vlgmr.msra.gmra.mrb[0].mxu0 %vm506_vm1, %v1375_v7  ;;  %v557_v12 = vrot.slane %v552_v10, %v556_v6 }
  0x14   : > { %1321 = vmatprep.mubr.msk.bf16.mxu0 %vm1439_vm0, %v1438_v2 }
  0x85   : > { %v567_v17 = vpop.permute.xlu0 %566 }
  0xe6   : > { %v544_v13 = vpop.f32.mrb[0].mxu0 }
  0xe7   : > { %v545_v14 = vadd.f32 %v1208_v11, %v544_v13  ;;  %v1295_v15 = vpop.f32.mrb[1].mxu0 }
  0xe8   : > { %v547_v16 = vpop.f32.mrb[2].mxu0 }
  0xe9   : > { %v559_v18 = vmul.f32 %v557_v12, %v545_v14  ;;  %v548_v19 = vadd.f32 %v1208_v11, %v547_v16  ;;  %v1296_v20 = vpop.f32.mrb[3].mxu0 }
  0xeb   : > { %v560_v21 = vmul.f32 %v557_v12, %v548_v19  ;;  %v1557_v22 = vadd.f32 %v567_v17, %v559_v18 }
  0xed   : > { %v1559_v23 = vadd.f32 %v567_v17, %v560_v21  ;;  %v572_v24 = vsel %vm571_vm2, %v1557_v22, 0.0  ;;  %v581_v26 = vmul.f32 %v1557_v22, %v1557_v22 }
  0xee   : > { %573 = vadd.xlane.f32.xlu0 %v572_v24 }
  0xef   : > { %v575_v25 = vsel %vm571_vm2, %v1559_v23, 0.0  ;;  %v583_v27 = vsel %vm571_vm2, %v581_v26, 0.0  ;;  %v582_v28 = vmul.f32 %v1559_v23, %v1559_v23 }
  0xf0   : > { %576 = vadd.xlane.f32.xlu1 %v575_v25 }
  0xf1   : > { %v586_v29 = vsel %vm571_vm2, %v582_v28, 0.0  ;;  %v1220_v28 = vld [vmem:[%s1707_s9] ss:$0 sm:$0xff] }
  0xf4   : > { %584 = vadd.xlane.f32.xlu1 %v583_v27 }
  0xf8   : > { %587 = vadd.xlane.f32.xlu1 %v586_v29 }
 0x17b   : > { %v574_v32 = vpop.xlane.xlu0 %573 }
 0x17c   : > { %v579_v34 = vmul.f32 0.03125, %v574_v32 }
 0x17d   : > { %v577_v33 = vpop.xlane.xlu1 %576 }
 0x17e   : > { %v591_v36 = vmul.f32 %v579_v34, %v579_v34  ;;  %v580_v37 = vmul.f32 0.03125, %v577_v33  ;;  %v595_v46 = vsub.f32 %v1557_v22, %v579_v34 }
 0x180   : > { %v592_v41 = vmul.f32 %v580_v37, %v580_v37  ;;  %v596_v50 = vsub.f32 %v1559_v23, %v580_v37 }
 0x181   : > { %v585_v35 = vpop.xlane.xlu1 %584 }
 0x182   : > { %v589_v38 = vmul.f32 0.03125, %v585_v35 }
 0x184   : > { %v593_v39 = vsub.f32 %v589_v38, %v591_v36 }
 0x185   : > { %v588_v40 = vpop.xlane.xlu1 %587 }
 0x186   : > { %v597_v42 = vadd.f32 1e-05, %v593_v39  ;;  %v590_v43 = vmul.f32 0.03125, %v588_v40 }
 0x188   : > { %1390 = vrsqrt.f32 %v597_v42  ;;  %v594_v44 = vsub.f32 %v590_v43, %v592_v41  ;;  %v1382_v41 = vld [vmem:[%s1704_s6 + $0x10] sm:$0xff]   ;;  %v1383_v42 = vld [vmem:[%s1704_s6 + $0x18] sm:$0xff]  }
 0x189   : > { %1318 = vmatpush3.bf16.msra.mxu0 %v1382_v41  ;;  %v1248_v41 = vld [vmem:[%s1707_s9 + $0x1] ss:$0 sm:$0xff] }
 0x18a   : > { %v598_v45 = vadd.f32 1e-05, %v594_v44  ;;  %1319 = vmatprep.subr.bf16.mxu0 %v1438_v2 }
 0x18c   : > { %1392 = vrsqrt.f32 %v598_v45 }
 0x18d   : > { %1320 = vmatpush3.bf16.msra.mxu0 %v1383_v42 }
 0x18e   : > { %1325 = vmatprep.subr.bf16.mxu0 %v1438_v2 }
 0x192   : > { %v1391_v47 = vpop.eup %1390 }
 0x193   : > { %v601_v48 = vmul.f32 %v1391_v47, %v595_v46 }
 0x195   : > { %v610_v53 = vmul.f32 %v1214_v49, %v601_v48 }
 0x196   : > { %v1393_v51 = vpop.eup %1392 }
 0x197   : > { %v602_v52 = vmul.f32 %v1393_v51, %v596_v50  ;;  %v619_v56 = vadd.f32 %v1215_v54, %v610_v53 }
 0x199   : > { %v611_v55 = vmul.f32 %v1214_v49, %v602_v52 }
 0x19b   : > { %v620_v57 = vadd.f32 %v1215_v54, %v611_v55 }
 0x19d   : > { %v621_v58 = vpack.c.bf16 %v620_v57, %v619_v56 }
 0x19f   : > { %1302 = vmatmul.mubr.msk.bf16.vlgmr.msra.gmra.mrb[0].mxu1 %vm571_vm2, %v621_v58 }
 0x1a0   : > { %1313 = vmatprep.mubr.msk.bf16.mxu1 %vm1439_vm0, %v1438_v2  ;;  %1306 = vmatpush3.bf16.msra.mxu1 %v1378_v59 }
 0x1a1   : > { %1307 = vmatprep.subr.bf16.mxu1 %v1438_v2 }
 0x1a4   : > { %1308 = vmatpush3.bf16.msra.mxu1 %v1379_v60  ;;  %v1227_v60 = vld [vmem:[%s1702_s4 + $0x1] ss:$0 sm:$0xff] }
 0x1a5   : > { %1309 = vmatprep.subr.bf16.mxu1 %v1438_v2 }
 0x1a8   : > { %1310 = vmatpush3.bf16.msra.mxu1 %v1380_v61 }
 0x1a9   : > { %1311 = vmatprep.subr.bf16.mxu1 %v1438_v2 }
 0x1ac   : > { %1312 = vmatpush3.bf16.msra.mxu1 %v1381_v62 }
 0x1ad   : > { %1337 = vmatprep.subr.bf16.mxu1 %v1438_v2 }
 0x272   : > { %v682_v0 = vpop.f32.mrb[0].mxu1 }
 0x273   : > { %v683_v1 = vadd.f32 %v1216_v63, %v682_v0  ;;  %v1303_v3 = vpop.f32.mrb[1].mxu1 }
 0x274   : > { %v685_v4 = vpop.f32.mrb[2].mxu1 }
 0x275   : > { %v689_v5 = vmul.f32 %v683_v1, %v683_v1  ;;  %v686_v6 = vadd.f32 %v1216_v63, %v685_v4  ;;  %v1304_v7 = vpop.f32.mrb[3].mxu1 }
 0x276   : > { %v1384_v7 = vld [vmem:[%s1706_s8 + $0x20] sm:$0xff]  }
 0x277   : > { %v691_v8 = vmul.f32 %v689_v5, %v683_v1  ;;  %v690_v9 = vmul.f32 %v686_v6, %v686_v6 }
 0x279   : > { %v693_v10 = vmul.f32 0.044715, %v691_v8  ;;  %v692_v11 = vmul.f32 %v690_v9, %v686_v6  ;;  %v1385_v8 = vld [vmem:[%s1706_s8 + $0x28] sm:$0xff]   ;;  %v1386_v9 = vld [vmem:[%s1706_s8 + $0x30] sm:$0xff]  }
 0x27b   : > { %v695_v12 = vadd.f32 %v693_v10, %v683_v1  ;;  %v694_v13 = vmul.f32 0.044715, %v692_v11  ;;  %v1387_v10 = vld [vmem:[%s1706_s8 + $0x38] sm:$0xff]   ;;  %v1235_v11 = vld [vmem:[%s1705_s7 + $0x1] ss:$0 sm:$0xff] }
 0x27d   : > { %v697_v14 = vmul.f32 0.7978846, %v695_v12  ;;  %v696_v15 = vadd.f32 %v694_v13, %v686_v6 }
 0x27f   : > { %1394 = vtanh.f32 %v697_v14  ;;  %v698_v16 = vmul.f32 0.7978846, %v696_v15 }
 0x281   : > { %1396 = vtanh.f32 %v698_v16 }
 0x289   : > { %v1395_v17 = vpop.eup %1394 }
 0x28a   : > { %v701_v18 = vadd.f32 1.0, %v1395_v17 }
 0x28b   : > { %v1397_v19 = vpop.eup %1396 }
 0x28c   : > { %v703_v20 = vmul.f32 0.5, %v701_v18  ;;  %v702_v21 = vadd.f32 1.0, %v1397_v19 }
 0x28e   : > { %v704_v24 = vmul.f32 0.5, %v702_v21  ;;  %v705_v25 = vmul.f32 %v703_v20, %v683_v1  ;;  %v1229_v1 = vld [vmem:[%s1703_s5 + $0x1] ss:$0 sm:$0xff] }
 0x290   : > { %v706_v26 = vmul.f32 %v704_v24, %v686_v6 }
 0x292   : > { %v707_v27 = vpack.c.bf16 %v706_v26, %v705_v25 }
 0x294   : > { %1314 = vmatmul.mubr.msk.bf16.vlgmr.msra.gmra.mrb[4].mxu1 %vm747_vm3, %v707_v27 }
 0x295   : > { %1341 = vmatprep.mubr.msk.bf16.mxu1 %vm1439_vm0, %v1438_v2 }
 0x367   : > { %v785_v29 = vpop.f32.mrb[4].mxu1 }
 0x368   : > { %v786_v30 = vadd.f32 %v1220_v28, %v785_v29  ;;  %v1315_v31 = vpop.f32.mrb[5].mxu1 }
 0x369   : > { %v788_v32 = vpop.f32.mrb[6].mxu1 }
 0x36a   : > { %v1616_v33 = vadd.f32 %v786_v30, %v1557_v22  ;;  %v789_v34 = vadd.f32 %v1220_v28, %v788_v32  ;;  %v1316_v35 = vpop.f32.mrb[7].mxu1 }
 0x36c   : > { %v1619_v36 = vadd.f32 %v789_v34, %v1559_v23  ;;  %v794_v37 = vsel %vm571_vm2, %v1616_v33, 0.0  ;;  %v802_v39 = vmul.f32 %v1616_v33, %v1616_v33 }
 0x36d   : > { %795 = vadd.xlane.f32.xlu1 %v794_v37 }
 0x36e   : > { %v797_v38 = vsel %vm571_vm2, %v1619_v36, 0.0  ;;  %v804_v40 = vsel %vm571_vm2, %v802_v39, 0.0  ;;  %v803_v22 = vmul.f32 %v1619_v36, %v1619_v36 }
 0x370   : > { %v807_v23 = vsel %vm571_vm2, %v803_v22, 0.0  ;;  %v1388_v22 = vld [vmem:[%s1708_s10] sm:$0xff]  }
 0x371   : > { %798 = vadd.xlane.f32.xlu1 %v797_v38  ;;  %1338 = vmatpush3.bf16.msra.mxu1 %v1388_v22 }
 0x372   : > { %1339 = vmatprep.subr.bf16.mxu1 %v1438_v2 }
 0x375   : > { %805 = vadd.xlane.f32.xlu1 %v804_v40 }
 0x379   : > { %808 = vadd.xlane.f32.xlu1 %v807_v23  ;;  %v1389_v23 = vld [vmem:[%s1708_s10 + $0x8] sm:$0xff]  }
 0x37a   : > { %1340 = vmatpush3.bf16.msra.mxu1 %v1389_v23 }
 0x3fa   : > { %v796_v43 = vpop.xlane.xlu1 %795 }
 0x3fb   : > { %v800_v45 = vmul.f32 0.03125, %v796_v43 }
 0x3fd   : > { %v812_v47 = vmul.f32 %v800_v45, %v800_v45  ;;  %v816_v57 = vsub.f32 %v1616_v33, %v800_v45 }
 0x3fe   : > { %v799_v44 = vpop.xlane.xlu1 %798 }
 0x3ff   : > { %v801_v48 = vmul.f32 0.03125, %v799_v44 }
 0x401   : > { %v813_v52 = vmul.f32 %v801_v48, %v801_v48  ;;  %v817_v61 = vsub.f32 %v1619_v36, %v801_v48 }
 0x402   : > { %v806_v46 = vpop.xlane.xlu1 %805 }
 0x403   : > { %v810_v49 = vmul.f32 0.03125, %v806_v46 }
 0x405   : > { %v814_v50 = vsub.f32 %v810_v49, %v812_v47 }
 0x406   : > { %v809_v51 = vpop.xlane.xlu1 %808 }
 0x407   : > { %v818_v53 = vadd.f32 1e-05, %v814_v50  ;;  %v811_v54 = vmul.f32 0.03125, %v809_v51  ;;  %v1254_v50 = vld [vmem:[%s1709_s11] ss:$0 sm:$0xff] }
 0x409   : > { %1398 = vrsqrt.f32 %v818_v53  ;;  %v815_v55 = vsub.f32 %v811_v54, %v813_v52 }
 0x40b   : > { %v819_v56 = vadd.f32 1e-05, %v815_v55 }
 0x40d   : > { %1400 = vrsqrt.f32 %v819_v56 }
 0x413   : > { %v1399_v58 = vpop.eup %1398 }
 0x414   : > { %v822_v59 = vmul.f32 %v1399_v58, %v816_v57 }
 0x416   : > { %v832_v0 = vmul.f32 %v1227_v60, %v822_v59 }
 0x417   : > { %v1401_v62 = vpop.eup %1400 }
 0x418   : > { %v823_v63 = vmul.f32 %v1401_v62, %v817_v61  ;;  %v842_v4 = vadd.f32 %v1229_v1, %v832_v0 }
 0x41a   : > { %v833_v3 = vmul.f32 %v1227_v60, %v823_v63 }
 0x41c   : > { %v843_v5 = vadd.f32 %v1229_v1, %v833_v3 }
 0x41e   : > { %v844_v6 = vpack.c.bf16 %v843_v5, %v842_v4 }
 0x420   : > { %1322 = vmatmul.mubr.msk.bf16.vlgmr.msra.gmra.mrb[4].mxu0 %vm571_vm2, %v844_v6 }
 0x421   : > { %1333 = vmatprep.mubr.msk.bf16.mxu0 %vm1439_vm0, %v1438_v2  ;;  %1326 = vmatpush3.bf16.msra.mxu0 %v1384_v7 }
 0x422   : > { %1327 = vmatprep.subr.bf16.mxu0 %v1438_v2 }
 0x425   : > { %1328 = vmatpush3.bf16.msra.mxu0 %v1385_v8 }
 0x426   : > { %1329 = vmatprep.subr.bf16.mxu0 %v1438_v2 }
 0x429   : > { %1330 = vmatpush3.bf16.msra.mxu0 %v1386_v9 }
 0x42a   : > { %1331 = vmatprep.subr.bf16.mxu0 %v1438_v2 }
 0x42d   : > { %1332 = vmatpush3.bf16.msra.mxu0 %v1387_v10 }
 0x4f3   : > { %v907_v12 = vpop.f32.mrb[4].mxu0 }
 0x4f4   : > { %v908_v13 = vadd.f32 %v1235_v11, %v907_v12  ;;  %v1323_v14 = vpop.f32.mrb[5].mxu0 }
 0x4f5   : > { %v910_v15 = vpop.f32.mrb[6].mxu0 }
 0x4f6   : > { %v914_v16 = vmul.f32 %v908_v13, %v908_v13  ;;  %v911_v17 = vadd.f32 %v1235_v11, %v910_v15  ;;  %v1324_v18 = vpop.f32.mrb[7].mxu0 }
 0x4f8   : > { %v916_v19 = vmul.f32 %v914_v16, %v908_v13  ;;  %v915_v20 = vmul.f32 %v911_v17, %v911_v17 }
 0x4fa   : > { %v918_v21 = vmul.f32 0.044715, %v916_v19  ;;  %v917_v24 = vmul.f32 %v915_v20, %v911_v17 }
 0x4fc   : > { %v920_v25 = vadd.f32 %v918_v21, %v908_v13  ;;  %v919_v26 = vmul.f32 0.044715, %v917_v24 }
 0x4fe   : > { %v922_v27 = vmul.f32 0.7978846, %v920_v25  ;;  %v921_v28 = vadd.f32 %v919_v26, %v911_v17 }
 0x500   : > { %1402 = vtanh.f32 %v922_v27  ;;  %v923_v29 = vmul.f32 0.7978846, %v921_v28 }
 0x502   : > { %1404 = vtanh.f32 %v923_v29 }
 0x50a   : > { %v1403_v30 = vpop.eup %1402 }
 0x50b   : > { %v926_v31 = vadd.f32 1.0, %v1403_v30 }
 0x50c   : > { %v1405_v32 = vpop.eup %1404 }
 0x50d   : > { %v928_v34 = vmul.f32 0.5, %v926_v31  ;;  %v927_v35 = vadd.f32 1.0, %v1405_v32 }
 0x50f   : > { %v929_v37 = vmul.f32 0.5, %v927_v35  ;;  %v930_v38 = vmul.f32 %v928_v34, %v908_v13 }
 0x511   : > { %v931_v39 = vmul.f32 %v929_v37, %v911_v17 }
 0x513   : > { %v932_v40 = vpack.c.bf16 %v931_v39, %v930_v38 }
 0x515   : > { %1334 = vmatmul.mubr.msk.bf16.vlgmr.msra.gmra.mrb[8].mxu0 %vm747_vm3, %v932_v40 }
 0x5e8   : > { %v1011_v42 = vpop.f32.mrb[8].mxu0 }
 0x5e9   : > { %v1012_v43 = vadd.f32 %v1248_v41, %v1011_v42  ;;  %v1335_v44 = vpop.f32.mrb[9].mxu0 }
 0x5ea   : > { %v1014_v45 = vpop.f32.mrb[10].mxu0 }
 0x5eb   : > { %v1015_v46 = vadd.f32 %v1248_v41, %v1014_v45  ;;  %v1336_v47 = vpop.f32.mrb[11].mxu0  ;;  %v1018_v48 = vadd.f32 %v1012_v43, %v1616_v33 }
 0x5ed   : > { %v1019_v49 = vadd.f32 %v1015_v46, %v1619_v36 }
 0x5ef   : > { %v1020_v2 = vpack.c.bf16 %v1019_v49, %v1018_v48 }
 0x5f1   : > { %1342 = vmatmul.mubr.msk.bf16.vlgmr.msra.gmra.mrb[8].mxu1 %vm571_vm2, %v1020_v2 }
 0x6c4   : > { %v1081_v51 = vpop.f32.mrb[8].mxu1 }
 0x6c5   : > { %v1082_v52 = vadd.f32 %v1254_v50, %v1081_v51  ;;  %v1343_v53 = vpop.f32.mrb[9].mxu1 }
 0x6c6   : > { %v1084_v54 = vpop.f32.mrb[10].mxu1 }
 0x6c7   : > { %v1258_v55 = vmul.f32 -1.442695, %v1082_v52  ;;  %v1085_v56 = vadd.f32 %v1254_v50, %v1084_v54  ;;  %v1344_v57 = vpop.f32.mrb[11].mxu1 }
 0x6c9   : > { %1406 = vpow2.f32 %v1258_v55  ;;  %v1259_v58 = vmul.f32 -1.442695, %v1085_v56 }
 0x6cb   : > { %1408 = vpow2.f32 %v1259_v58 }
 0x6d3   : > { %v1407_v33 = vpop.eup %1406 }
 0x6d4   : > { %v1094_v36 = vadd.f32 1.0, %v1407_v33 }
 0x6d5   : > { %v1409_v59 = vpop.eup %1408 }
 0x6d6   : > { %1410 = vrcp.f32 %v1094_v36  ;;  %v1095_v60 = vadd.f32 1.0, %v1409_v59 }
 0x6d8   : > { %1412 = vrcp.f32 %v1095_v60 }
 0x6e0   : > { %v1411_v61 = vpop.eup %1410 }
 0x6e1   : > { %1101 = vst.msk [vmem:[%s465_s16] sm:$0xff] %vm1100_vm4, %v1411_v61 }
 0x6e2   : > { %v1413_v62 = vpop.eup %1412 }
 0x6e3   : > { %1102 = vst.msk [vmem:[%s465_s16 + $0x8] sm:$0xff] %vm1100_vm4, %v1413_v62 }
 0x6e4 PF: > { %s22_s23 = sadd.s32 1, %s1436_s23   ;;  %s1711_s21 = smov %s1432_s22 }
 0x6e5   : > { %p19_p5 = scmp.ge.s32.totalorder %s22_s23, 4   ;;  %s1712_s22 = smov %s1714_s24 }
 0x6e7   :  { %21 = sbr.rel (!%p19_p5) target bundleno = 2 (0x2), region = 107 }

</bundles_post_ra>
